<compile_context>
chip_gen: v7x
topology: tpu7x:2x2x1
jax: 0.10.0
libtpu: 0.0.40
codegen_flags: <defaults>
</compile_context>

<pallas_src>
import functools

import jax
import jax.numpy as jnp
from jax.experimental import pallas as pl
from jax.experimental.pallas import tpu as pltpu


def _mlp_kernel(x_ref, w1_ref, b1_ref, w2_ref, b2_ref, w3_ref, b3_ref, o_ref):
    # Feature-major: x is (d_in, TILE_B); weights are PyTorch-native (out, in);
    # biases are (out, 1) f32 column vectors broadcasting along lanes.
    x = x_ref[...]                                                         # (28, TB)
    h = jnp.dot(w1_ref[...], x, preferred_element_type=jnp.float32) + b1_ref[...]
    h = jnp.maximum(h, 0.0).astype(w2_ref.dtype)                           # (64, TB)
    h = jnp.dot(w2_ref[...], h, preferred_element_type=jnp.float32) + b2_ref[...]
    h = jnp.maximum(h, 0.0).astype(w3_ref.dtype)                           # (32, TB)
    mu = jnp.dot(w3_ref[...], h, preferred_element_type=jnp.float32) + b3_ref[...]
    o_ref[...] = jnp.tanh(mu).astype(o_ref.dtype)                          # (8,  TB)


def _round_up(x, m):
    return -(-x // m) * m


@functools.partial(jax.jit, static_argnames=("tile_b", "compute_dtype"))
def network_i_forward(state, w1, b1, w2, b2, w3, b3, *,
                      tile_b=2048, compute_dtype=jnp.bfloat16):
    """y = tanh(relu(relu(x @ w1^T + b1) @ w2^T + b2) @ w3^T + b3).

    Weights use PyTorch-native layout (out_features, in_features); biases are
    (out_features, 1) float32. Matmul inputs run in `compute_dtype` (bf16 default)
    with f32 accumulation; bias-add / ReLU / tanh stay in f32.
    """
    squeeze = state.ndim == 1
    if squeeze:
        state = state[None, :]
    B, d_in = state.shape
    n_actions = w3.shape[0]

    # Compute-dtype weights (no-op casts if already that dtype); biases stay f32.
    w1 = w1.astype(compute_dtype)
    w2 = w2.astype(compute_dtype)
    w3 = w3.astype(compute_dtype)
    b1 = b1.astype(jnp.float32)
    b2 = b2.astype(jnp.float32)
    b3 = b3.astype(jnp.float32)

    # Batch lives on the lane axis: pad to a multiple of 128 lanes; single grid
    # step when the whole (padded) batch fits one tile.
    b_pad = _round_up(max(B, 128), 128)
    tb = min(_round_up(tile_b, 128), b_pad)
    b_pad = _round_up(b_pad, tb)

    # One fused wrapper pass: transpose (feature-major) + cast + lane pad.
    x_t = jnp.pad(state.T.astype(compute_dtype), ((0, 0), (0, b_pad - B)))

    const = lambda a: pl.BlockSpec(a.shape, lambda i: (0, 0))

    out_t = pl.pallas_call(
        _mlp_kernel,
        out_shape=jax.ShapeDtypeStruct((n_actions, b_pad), jnp.float32),
        grid=(b_pad // tb,),
        in_specs=[
            pl.BlockSpec((d_in, tb), lambda i: (0, i)),      # state tile, batch in lanes
            const(w1), const(b1),
            const(w2), const(b2),
            const(w3), const(b3),
        ],
        out_specs=pl.BlockSpec((n_actions, tb), lambda i: (0, i)),  # lane-dense output
        compiler_params=pltpu.CompilerParams(
            dimension_semantics=("parallel",),
        ),
    )(x_t, w1, b1, w2, b2, w3, b3)

    out = out_t[:, :B].T            # back to (B, n_actions); tiny array
    return out[0] if squeeze else out


def init_params(key, input_dims, n_fc1, n_fc2, n_actions):
    """PyTorch nn.Linear-style init (uniform +/- 1/sqrt(fan_in)).
    Weights in PyTorch-native layout (out_features, in_features); biases (out, 1) f32."""
    def linear(key, fan_in, fan_out):
        kw, kb = jax.random.split(key)
        bound = 1.0 / jnp.sqrt(fan_in)
        w = jax.random.uniform(kw, (fan_out, fan_in), jnp.float32, -bound, bound)
        b = jax.random.uniform(kb, (fan_out, 1), jnp.float32, -bound, bound)
        return w, b

    k1, k2, k3 = jax.random.split(key, 3)
    w1, b1 = linear(k1, input_dims, n_fc1)
    w2, b2 = linear(k2, n_fc1, n_fc2)
    w3, b3 = linear(k3, n_fc2, n_actions)
    return w1, b1, w2, b2, w3, b3


def reference_forward(state, w1, b1, w2, b2, w3, b3):
    f32 = lambda a: a.astype(jnp.float32)
    hi = jax.lax.Precision.HIGHEST
    h1 = jnp.maximum(jnp.dot(f32(state), f32(w1).T, precision=hi) + f32(b1).ravel(), 0.0)
    h2 = jnp.maximum(jnp.dot(h1, f32(w2).T, precision=hi) + f32(b2).ravel(), 0.0)
    return jnp.tanh(jnp.dot(h2, f32(w3).T, precision=hi) + f32(b3).ravel())


if __name__ == "__main__":
    # Shapes consistent with the module: input_dims=[28], n_actions=8.
    input_dims, n_fc1, n_fc2, n_actions = 28, 64, 32, 8

    key = jax.random.PRNGKey(0)
    k_state, k_params, k_big = jax.random.split(key, 3)
    params = init_params(k_params, input_dims, n_fc1, n_fc2, n_actions)

    # --- small-batch correctness, exact-f32 compute path (single tile) ---
    batch = 8
    state = jax.random.normal(k_state, (batch, input_dims), dtype=jnp.float32)
    out = jax.block_until_ready(
        network_i_forward(state, *params, compute_dtype=jnp.float32))
    ref = reference_forward(state, *params)
    assert out.shape == (batch, n_actions)
    assert jnp.allclose(out, ref, atol=1e-4, rtol=1e-4), "f32 mismatch vs reference"

    # --- multi-tile grid path + ragged batch (300 rows -> 3 tiles of 128, f32) ---
    big_batch = 300
    big_state = jax.random.normal(k_big, (big_batch, input_dims), dtype=jnp.float32)
    out_big = jax.block_until_ready(
        network_i_forward(big_state, *params, tile_b=128, compute_dtype=jnp.float32))
    ref_big = reference_forward(big_state, *params)
    assert out_big.shape == (big_batch, n_actions)
    assert jnp.allclose(out_big, ref_big, atol=1e-4, rtol=1e-4), "tiled f32 mismatch"

    # --- default bf16 compute path (bf16 MXU inputs, f32 accumulation) ---
    out_bf16 = jax.block_until_ready(
        network_i_forward(big_state, *params, tile_b=128))
    assert out_bf16.shape == (big_batch, n_actions)
    assert jnp.allclose(out_bf16, ref_big, atol=5e-2, rtol=5e-2), "bf16 mismatch vs f32 ref"

    print("KERNEL_OK")
</pallas_src>

<mosaic_0001>
module attributes {stable_mosaic.version = 11 : i64} {
  func.func @_mlp_kernel(%arg0: i32, %arg1: memref<28x128xf32, #tpu.memory_space<vmem>>, %arg2: memref<64x28xf32, #tpu.memory_space<vmem>>, %arg3: memref<64x1xf32, #tpu.memory_space<vmem>>, %arg4: memref<32x64xf32, #tpu.memory_space<vmem>>, %arg5: memref<32x1xf32, #tpu.memory_space<vmem>>, %arg6: memref<8x32xf32, #tpu.memory_space<vmem>>, %arg7: memref<8x1xf32, #tpu.memory_space<vmem>>, %arg8: memref<8x128xf32, #tpu.memory_space<vmem>>) attributes {dimension_semantics = [#tpu.dimension_semantics<parallel>], iteration_bounds = array<i64: 1>, scalar_prefetch = 0 : i64, scratch_operands = 0 : i64, tpu.core_type = #tpu.core_type<tc>, window_params = [{transform_indices = @transform_0, window_bounds = array<i64: 28, 128>}, {pipeline_mode = #tpu.pipeline_mode<synchronous>, transform_indices = @transform_1, window_bounds = array<i64: 64, 28>}, {pipeline_mode = #tpu.pipeline_mode<synchronous>, transform_indices = @transform_2, window_bounds = array<i64: 64, 1>}, {pipeline_mode = #tpu.pipeline_mode<synchronous>, transform_indices = @transform_3, window_bounds = array<i64: 32, 64>}, {pipeline_mode = #tpu.pipeline_mode<synchronous>, transform_indices = @transform_4, window_bounds = array<i64: 32, 1>}, {pipeline_mode = #tpu.pipeline_mode<synchronous>, transform_indices = @transform_5, window_bounds = array<i64: 8, 32>}, {pipeline_mode = #tpu.pipeline_mode<synchronous>, transform_indices = @transform_6, window_bounds = array<i64: 8, 1>}, {transform_indices = @transform_7, window_bounds = array<i64: 8, 128>}]} {
    %c0 = arith.constant 0 : index
    %c0_0 = arith.constant 0 : index
    %0 = vector.load %arg1[%c0, %c0_0] : memref<28x128xf32, #tpu.memory_space<vmem>>, vector<28x128xf32>
    %c0_1 = arith.constant 0 : index
    %c0_2 = arith.constant 0 : index
    %1 = vector.load %arg2[%c0_1, %c0_2] : memref<64x28xf32, #tpu.memory_space<vmem>>, vector<64x28xf32>
    %cst = arith.constant dense<0.000000e+00> : vector<64x128xf32>
    %2 = tpu.matmul %1, %0, %cst {dimension_numbers = #tpu.dot_dimension_numbers<[1], [0], [0], [1], [0, 0, 1, 1], [], []>} : vector<64x28xf32>, vector<28x128xf32>, vector<64x128xf32> -> vector<64x128xf32>
    %c0_3 = arith.constant 0 : index
    %c0_4 = arith.constant 0 : index
    %3 = vector.load %arg3[%c0_3, %c0_4] : memref<64x1xf32, #tpu.memory_space<vmem>>, vector<64x1xf32>
    %4 = vector.broadcast %3 : vector<64x1xf32> to vector<64x128xf32>
    %5 = arith.addf %2, %4 : vector<64x128xf32>
    %cst_5 = arith.constant 0.000000e+00 : f32
    %6 = vector.broadcast %cst_5 : f32 to vector<64x128xf32>
    %7 = arith.maximumf %5, %6 : vector<64x128xf32>
    %c0_6 = arith.constant 0 : index
    %c0_7 = arith.constant 0 : index
    %8 = vector.load %arg4[%c0_6, %c0_7] : memref<32x64xf32, #tpu.memory_space<vmem>>, vector<32x64xf32>
    %cst_8 = arith.constant dense<0.000000e+00> : vector<32x128xf32>
    %9 = tpu.matmul %8, %7, %cst_8 {dimension_numbers = #tpu.dot_dimension_numbers<[1], [0], [0], [1], [0, 0, 1, 1], [], []>} : vector<32x64xf32>, vector<64x128xf32>, vector<32x128xf32> -> vector<32x128xf32>
    %c0_9 = arith.constant 0 : index
    %c0_10 = arith.constant 0 : index
    %10 = vector.load %arg5[%c0_9, %c0_10] : memref<32x1xf32, #tpu.memory_space<vmem>>, vector<32x1xf32>
    %11 = vector.broadcast %10 : vector<32x1xf32> to vector<32x128xf32>
    %12 = arith.addf %9, %11 : vector<32x128xf32>
    %cst_11 = arith.constant 0.000000e+00 : f32
    %13 = vector.broadcast %cst_11 : f32 to vector<32x128xf32>
    %14 = arith.maximumf %12, %13 : vector<32x128xf32>
    %c0_12 = arith.constant 0 : index
    %c0_13 = arith.constant 0 : index
    %15 = vector.load %arg6[%c0_12, %c0_13] : memref<8x32xf32, #tpu.memory_space<vmem>>, vector<8x32xf32>
    %cst_14 = arith.constant dense<0.000000e+00> : vector<8x128xf32>
    %16 = tpu.matmul %15, %14, %cst_14 {dimension_numbers = #tpu.dot_dimension_numbers<[1], [0], [0], [1], [0, 0, 1, 1], [], []>} : vector<8x32xf32>, vector<32x128xf32>, vector<8x128xf32> -> vector<8x128xf32>
    %c0_15 = arith.constant 0 : index
    %c0_16 = arith.constant 0 : index
    %17 = vector.load %arg7[%c0_15, %c0_16] : memref<8x1xf32, #tpu.memory_space<vmem>>, vector<8x1xf32>
    %18 = vector.broadcast %17 : vector<8x1xf32> to vector<8x128xf32>
    %19 = arith.addf %16, %18 : vector<8x128xf32>
    %20 = math.tanh %19 : vector<8x128xf32>
    %c0_17 = arith.constant 0 : index
    %c0_18 = arith.constant 0 : index
    %21 = vector.load %arg8[%c0_17, %c0_18] : memref<8x128xf32, #tpu.memory_space<vmem>>, vector<8x128xf32>
    tpu.vector_store %arg8[%c0_17, %c0_18], %20 {strides = array<i32>} : memref<8x128xf32, #tpu.memory_space<vmem>>, vector<8x128xf32>,
    return
  }
  func.func @transform_0(%arg0: i32) -> (i32, i32) {
    %c0_i32 = arith.constant 0 : i32
    %c0_i32_0 = arith.constant 0 : i32
    return %c0_i32, %arg0 : i32, i32
  }
  func.func @transform_1(%arg0: i32) -> (i32, i32) {
    %c0_i32 = arith.constant 0 : i32
    %c0_i32_0 = arith.constant 0 : i32
    %c0_i32_1 = arith.constant 0 : i32
    return %c0_i32, %c0_i32_0 : i32, i32
  }
  func.func @transform_2(%arg0: i32) -> (i32, i32) {
    %c0_i32 = arith.constant 0 : i32
    %c0_i32_0 = arith.constant 0 : i32
    %c0_i32_1 = arith.constant 0 : i32
    return %c0_i32, %c0_i32_0 : i32, i32
  }
  func.func @transform_3(%arg0: i32) -> (i32, i32) {
    %c0_i32 = arith.constant 0 : i32
    %c0_i32_0 = arith.constant 0 : i32
    %c0_i32_1 = arith.constant 0 : i32
    return %c0_i32, %c0_i32_0 : i32, i32
  }
  func.func @transform_4(%arg0: i32) -> (i32, i32) {
    %c0_i32 = arith.constant 0 : i32
    %c0_i32_0 = arith.constant 0 : i32
    %c0_i32_1 = arith.constant 0 : i32
    return %c0_i32, %c0_i32_0 : i32, i32
  }
  func.func @transform_5(%arg0: i32) -> (i32, i32) {
    %c0_i32 = arith.constant 0 : i32
    %c0_i32_0 = arith.constant 0 : i32
    %c0_i32_1 = arith.constant 0 : i32
    return %c0_i32, %c0_i32_0 : i32, i32
  }
  func.func @transform_6(%arg0: i32) -> (i32, i32) {
    %c0_i32 = arith.constant 0 : i32
    %c0_i32_0 = arith.constant 0 : i32
    %c0_i32_1 = arith.constant 0 : i32
    return %c0_i32, %c0_i32_0 : i32, i32
  }
  func.func @transform_7(%arg0: i32) -> (i32, i32) {
    %c0_i32 = arith.constant 0 : i32
    %c0_i32_0 = arith.constant 0 : i32
    return %c0_i32, %arg0 : i32, i32
  }
}

</mosaic_0001>

<bundles_post_ra>
// kernel: network_i_forward.1
= control target key start
LH: loop header
LB: loop body
LE: loop exit
PB: predicated region body
PF: predicated region fallthrough
CT: control target
= control target key end

     0   :  { %vm111_vm0 = vcmask 1043456   ;;  %vm86_vm1 = vcmask 228352   ;;  %v582_v3 = vmov 0   ;;  %vm583_vm2 = vmmov 1   ;;  %s733_s0 = inlined_call_operand.vmem [shape: f32[28,128], index: 0, kind: input, shape index: {}]   ;;  %s734_s1 = inlined_call_operand.vmem [shape: f32[64,28], index: 1, kind: input, shape index: {}]   ;;  %s735_s2 = inlined_call_operand.vmem [shape: f32[64,1], index: 2, kind: input, shape index: {}]   ;;  %s736_s4 = inlined_call_operand.vmem [shape: f32[32,1], index: 4, kind: input, shape index: {}]   ;;  %s737_s6 = inlined_call_operand.vmem [shape: f32[8,1], index: 6, kind: input, shape index: {}]   ;;  %s738_s3 = inlined_call_operand.vmem [shape: f32[32,64], index: 3, kind: input, shape index: {}]   ;;  %s739_s5 = inlined_call_operand.vmem [shape: f32[8,32], index: 5, kind: input, shape index: {}]   ;;  %s740_s7 = inlined_call_operand.vmem [shape: f32[8,128], index: 7, kind: output, shape index: {}]  }
   0x1   :  { %v26_v0 = vld [vmem:[%s733_s0] sm:$0xff]  ;;  %v27_v1 = vld [vmem:[%s733_s0 + $0x8] sm:$0xff]  ;;  %v28_v2 = vld [vmem:[%s733_s0 + $0x10] sm:$0xff]  ;;  %578 = vset.pattern.permute.xlu0 %v582_v3  ;;  %579 = vset.pattern.permute.xlu1 %v582_v3  ;;  %vm256_vm4 = vcmask 523264   ;;  %vm585_vm5 = vmmov 0   ;;  %vm365_vm6 = vcmask 261120  }
   0x2   :  { %v541_v4 = vpack.c.bf16 %v27_v1, %v26_v0  ;;  %v29_v5 = vld [vmem:[%s733_s0 + $0x18] sm:$0xf]  ;;  %v30_v6 = vld [vmem:[%s734_s1] sm:$0xff]  ;;  %vm546_vm3 = vmpackc.low %vm111_vm0, %vm583_vm2 }
   0x3   :  { %v545_v7 = vpack.c.bf16 %v29_v5, %v28_v2  ;;  %496 = vmatprep.mubr.msk.f32.mxu0 %vm86_vm1, %v30_v6  ;;  %v38_v8 = vld [vmem:[%s735_s2] sm:$0xff]  ;;  %v40_v9 = vld [vmem:[%s735_s2 + $0x10] sm:$0xff]  ;;  %v39_v10 = vld [vmem:[%s735_s2 + $0x8] sm:$0xff]  ;;  %v586_v5 = vmov 0.0  }
   0x4   :  { %542 = vmatprep.subr.bf16.mxu0 %v541_v4  ;;  %48 = vperm.xlu0 %578, %v38_v8   ;;  %v41_v11 = vld [vmem:[%s735_s2 + $0x18] sm:$0xff]  ;;  %v31_v12 = vld [vmem:[%s734_s1 + $0x8] sm:$0xff]  ;;  %v32_v13 = vld [vmem:[%s734_s1 + $0x10] sm:$0xff] }
   0x5   :  { %544 = vmatpush3.bf16.msra.mxu0 %v541_v4  ;;  %58 = vperm.xlu1 %579, %v40_v9   ;;  %v42_v14 = vld [vmem:[%s735_s2 + $0x20] sm:$0xff]  ;;  %v43_v15 = vld [vmem:[%s735_s2 + $0x28] sm:$0xff]  ;;  %v33_v16 = vld [vmem:[%s734_s1 + $0x18] sm:$0xff]  ;;  %v584_v4 = vmov 0.0|0.0  }
   0x6   :  { %547 = vmatprep.subr.msk.bf16.mxu0 %vm546_vm3, %v545_v7  ;;  %v34_v17 = vld [vmem:[%s734_s1 + $0x20] sm:$0xff]  ;;  %v44_v18 = vld [vmem:[%s735_s2 + $0x30] sm:$0xff]  ;;  %v45_v19 = vld [vmem:[%s735_s2 + $0x38] sm:$0xff] }
   0x7   :  { %v35_v20 = vld [vmem:[%s734_s1 + $0x28] sm:$0xff]  ;;  %v36_v21 = vld [vmem:[%s734_s1 + $0x30] sm:$0xff]  ;;  %v232_v22 = vld [vmem:[%s736_s4] sm:$0xff] }
   0x8   :  { %53 = vperm.xlu0 %578, %v39_v10   ;;  %v233_v23 = vld [vmem:[%s736_s4 + $0x8] sm:$0xff]  ;;  %v37_v24 = vld [vmem:[%s734_s1 + $0x38] sm:$0xff]  ;;  %v234_v25 = vld [vmem:[%s736_s4 + $0x10] sm:$0xff] }
   0x9   :  { %550 = vmatpush3.bf16.msk.msra.mxu0 %vm546_vm3, %v545_v7  ;;  %63 = vperm.xlu1 %579, %v41_v11   ;;  %v235_v26 = vld [vmem:[%s736_s4 + $0x18] sm:$0xff]  ;;  %v359_v27 = vld [vmem:[%s737_s6] sm:$0xff]  ;;  %v229_v1 = vld [vmem:[%s738_s3 + $0x8] sm:$0xff] }
   0xa   :  { %v228_v28 = vld [vmem:[%s738_s3] sm:$0xff]  ;;  %v230_v2 = vld [vmem:[%s738_s3 + $0x10] sm:$0xff]  ;;  %v231_v3 = vld [vmem:[%s738_s3 + $0x18] sm:$0xff]  ;;  %567 = vmatprep.subr.bf16.mxu0 %v584_v4 }
   0xb   :  { %524 = vmatprep.mubr.msk.f32.mxu1 %vm256_vm4, %v228_v28 }
   0xc   :  { %497 = vmatmul.mubr.msk.f32.vlgmr.msra.gmra.mrb[0].mxu0 %vm86_vm1, %v31_v12  ;;  %68 = vperm.xlu0 %578, %v42_v14  }
   0xd   :  { %499 = vmatprep.mubr.msk.f32.mxu0 %vm86_vm1, %v32_v13  ;;  %73 = vperm.xlu1 %579, %v43_v15  }
  0x10   :  { %500 = vmatmul.mubr.msk.f32.gmra.mrb[2].mxu0 %vm86_vm1, %v33_v16  ;;  %78 = vperm.xlu0 %578, %v44_v18  }
  0x11   :  { %502 = vmatprep.mubr.msk.f32.mxu0 %vm86_vm1, %v34_v17  ;;  %83 = vperm.xlu1 %579, %v45_v19  }
  0x14   :  { %503 = vmatmul.mubr.msk.f32.gmra.mrb[4].mxu0 %vm86_vm1, %v35_v20  ;;  %238 = vperm.xlu0 %578, %v232_v22  }
  0x15   :  { %505 = vmatprep.mubr.msk.f32.mxu0 %vm86_vm1, %v36_v21  ;;  %243 = vperm.xlu1 %579, %v233_v23  }
  0x18   :  { %506 = vmatmul.mubr.msk.f32.gmra.mrb[6].mxu0 %vm86_vm1, %v37_v24  ;;  %248 = vperm.xlu0 %578, %v234_v25   ;;  %v358_v24 = vld [vmem:[%s739_s5] sm:$0xff] }
  0x19   :  { %253 = vperm.xlu1 %579, %v235_v26   ;;  %538 = vmatprep.mubr.msk.f32.mxu0 %vm585_vm5, %v586_v5 }
  0x1c   :  { %362 = vperm.xlu0 %578, %v359_v27  }
  0x83   :  { %v49_v29 = vpop.permute.xlu0 %48 }
  0x84   :  { %v59_v30 = vpop.permute.xlu1 %58 }
  0x87   :  { %v54_v31 = vpop.permute.xlu0 %53 }
  0x88   :  { %v64_v32 = vpop.permute.xlu1 %63 }
  0x8b   :  { %v69_v45 = vpop.permute.xlu0 %68 }
  0x8c   :  { %v74_v42 = vpop.permute.xlu1 %73 }
  0x8f   :  { %v79_v57 = vpop.permute.xlu0 %78 }
  0x90   :  { %v84_v54 = vpop.permute.xlu1 %83 }
  0x93   :  { %v239_v7 = vpop.permute.xlu0 %238 }
  0x94   :  { %v244_v6 = vpop.permute.xlu1 %243 }
  0x97   :  { %v249_v16 = vpop.permute.xlu0 %248 }
  0x98   :  { %v254_v13 = vpop.permute.xlu1 %253 }
  0x9b   :  { %v363_v25 = vpop.permute.xlu0 %362 }
  0xdf   :  { %v498_v33 = vpop.f32.mrb[0].mxu0 }
  0xe0   :  { %v187_v34 = vadd.f32 %v498_v33, %v54_v31  ;;  %v181_v35 = vpop.f32.mrb[1].mxu0 }
  0xe1   :  { %v182_v36 = vadd.f32 %v181_v35, %v49_v29 }
  0xe2   :  { %v221_v37 = vmax.f32 %v187_v34, 0.0 }
  0xe3   :  { %v220_v38 = vmax.f32 %v182_v36, 0.0  ;;  %v501_v39 = vpop.f32.mrb[2].mxu0 }
  0xe4   :  { %v197_v40 = vadd.f32 %v501_v39, %v64_v32  ;;  %v191_v41 = vpop.f32.mrb[3].mxu0 }
  0xe5   :  { %v192_v43 = vadd.f32 %v191_v41, %v59_v30  ;;  %v551_v44 = vpack.c.bf16 %v221_v37, %v220_v38 }
  0xe6   :  { %v223_v46 = vmax.f32 %v197_v40, 0.0 }
  0xe7   :  { %v222_v47 = vmax.f32 %v192_v43, 0.0  ;;  %v504_v48 = vpop.f32.mrb[4].mxu0  ;;  %552 = vmatprep.subr.bf16.mxu1 %v551_v44 }
  0xe8   :  { %v207_v49 = vadd.f32 %v504_v48, %v74_v42  ;;  %v201_v50 = vpop.f32.mrb[5].mxu0  ;;  %554 = vmatpush3.bf16.msra.mxu1 %v551_v44 }
  0xe9   :  { %v555_v51 = vpack.c.bf16 %v223_v46, %v222_v47  ;;  %v202_v52 = vadd.f32 %v201_v50, %v69_v45 }
  0xea   :  { %v225_v53 = vmax.f32 %v207_v49, 0.0 }
  0xeb   :  { %v224_v55 = vmax.f32 %v202_v52, 0.0  ;;  %v507_v56 = vpop.f32.mrb[6].mxu0  ;;  %556 = vmatprep.subr.bf16.mxu1 %v555_v51 }
  0xec   :  { %v217_v58 = vadd.f32 %v507_v56, %v84_v54  ;;  %v211_v59 = vpop.f32.mrb[7].mxu0  ;;  %558 = vmatpush3.bf16.msra.mxu1 %v555_v51 }
  0xed   :  { %v559_v60 = vpack.c.bf16 %v225_v53, %v224_v55  ;;  %v212_v61 = vadd.f32 %v211_v59, %v79_v57 }
  0xee   :  { %v227_v62 = vmax.f32 %v217_v58, 0.0 }
  0xef   :  { %v226_v63 = vmax.f32 %v212_v61, 0.0  ;;  %560 = vmatprep.subr.bf16.mxu1 %v559_v60 }
  0xf0   :  { %562 = vmatpush3.bf16.msra.mxu1 %v559_v60 }
  0xf1   :  { %v563_v0 = vpack.c.bf16 %v227_v62, %v226_v63 }
  0xf3   :  { %564 = vmatprep.subr.bf16.mxu1 %v563_v0 }
  0xf4   :  { %566 = vmatpush3.bf16.msra.mxu1 %v563_v0 }
  0xf7   :  { %525 = vmatmul.mubr.msk.f32.vlgmr.msra.gmra.mrb[0].mxu1 %vm256_vm4, %v229_v1 }
  0xf8   :  { %527 = vmatprep.mubr.msk.f32.mxu1 %vm256_vm4, %v230_v2 }
  0xfb   :  { %528 = vmatmul.mubr.msk.f32.gmra.mrb[2].mxu1 %vm256_vm4, %v231_v3 }
 0x1ca   :  { %v526_v8 = vpop.f32.mrb[0].mxu1 }
 0x1cb   :  { %v341_v9 = vadd.f32 %v526_v8, %v244_v6  ;;  %v335_v10 = vpop.f32.mrb[1].mxu1 }
 0x1cc   :  { %v336_v11 = vadd.f32 %v335_v10, %v239_v7 }
 0x1cd   :  { %v355_v12 = vmax.f32 %v341_v9, 0.0 }
 0x1ce   :  { %v354_v14 = vmax.f32 %v336_v11, 0.0  ;;  %v529_v15 = vpop.f32.mrb[2].mxu1 }
 0x1cf   :  { %v351_v17 = vadd.f32 %v529_v15, %v254_v13  ;;  %v345_v18 = vpop.f32.mrb[3].mxu1 }
 0x1d0   :  { %v568_v19 = vpack.c.bf16 %v355_v12, %v354_v14  ;;  %v346_v20 = vadd.f32 %v345_v18, %v249_v16 }
 0x1d1   :  { %v357_v21 = vmax.f32 %v351_v17, 0.0 }
 0x1d2   :  { %v356_v22 = vmax.f32 %v346_v20, 0.0  ;;  %569 = vmatpush3.bf16.msra.mxu0 %v568_v19 }
 0x1d3   :  { %570 = vmatprep.subr.bf16.mxu0 %v584_v4 }
 0x1d4   :  { %v571_v23 = vpack.c.bf16 %v357_v21, %v356_v22 }
 0x1d6   :  { %572 = vmatpush3.bf16.msra.mxu0 %v571_v23 }
 0x1d9   :  { %539 = vmatmul.mubr.msk.f32.vlgmr.msra.gmra.mrb[8].mxu0 %vm365_vm6, %v358_v24 }
 0x2ac   :  { %v435_v26 = vpop.f32.mrb[8].mxu0 }
 0x2ad   :  { %v436_v27 = vadd.f32 %v435_v26, %v363_v25  ;;  %v540_v28 = vpop.f32.mrb[9].mxu0 }
 0x2af   :  { %580 = vtanh.f32 %v436_v27 }
 0x2b9   :  { %v581_v29 = vpop.eup %580 }
 0x2ba   :  { %440 = vst [vmem:[%s740_s7] sm:$0xff] %v581_v29 }

</bundles_post_ra>
